<compile_context>
chip_gen: v6e
topology: v6e:2x2x1
jax: 0.10.0
libtpu: 0.0.40
codegen_flags: <defaults>
</compile_context>

<pallas_src>
import jax
import jax.numpy as jnp
from jax.experimental import pallas as pl
from jax.experimental.pallas import tpu as pltpu


def _detect_vmem_bytes():
    """Physical VMEM per TensorCore (128 MiB on v5e/v6e, 64 MiB per TC on v7x)."""
    default = 64 * 1024 * 1024          # conservative (v7x-sized) fallback
    try:
        info = pltpu.get_tpu_info()
    except Exception:
        return default
    for name in ("vmem_capacity_bytes", "vmem_bytes", "vmem_size_bytes"):
        v = getattr(info, name, None)
        if isinstance(v, int) and v > 0:
            return int(v)
    return default


def _round_up(x, m):
    return (x + m - 1) // m * m


def _choose_blocks(n, c, hw, itemsize, vmem_bytes):
    """Pick (tile_n, tile_hw).

    Budget: double-buffered input + output blocks plus one f32 intermediate
    per block element must fit in ~half of physical VMEM, leaving headroom
    for compiler-internal scratch on v7x's 64 MiB.
    """
    usable = max(vmem_bytes // 2, 8 * 1024 * 1024)
    per_elem = 4 * itemsize + 4          # 2x in + 2x out buffers + f32 temp
    max_elems = max(usable // per_elem, 128)

    if hw >= 128:
        # Lane-dense HW tiling, one batch sample per block.  No artificial
        # lane cap: the byte budget alone sets the tile.
        t = (max_elems // max(c, 1)) // 128 * 128
        t = max(t, 128)                  # guard: extreme C could exceed budget
        t = min(t, hw)
        tn = 1
    else:
        # Tiny feature maps (deep decoder levels): full HW per block, pack
        # several batch samples per step to amortize per-step overhead.
        t = hw
        tn = max(min(n, max_elems // max(c * hw, 1)), 1)
    return tn, t


def _sse_kernel(x_ref, w_ref, b_ref, o_ref):
    # x_ref: (TN, C, T) VMEM   w_ref: (1, C, 1) VMEM f32   b_ref: (1,) SMEM f32
    # o_ref: (TN, C, T) VMEM
    x = x_ref[...]
    xf = x.astype(jnp.float32)                       # cast once, reuse below

    # 1x1 conv over channels: broadcast multiply (VPU) + sublane reduce (XLU).
    att = jnp.sum(xf * w_ref[...], axis=1, keepdims=True) + b_ref[0]  # (TN,1,T)
    att = jax.nn.sigmoid(att)                                         # EUP

    if x.dtype == jnp.float32:
        o_ref[...] = xf * att
    else:
        # Native-dtype scale: bf16 multiply + store keeps packed vregs on
        # v6e/v7x (v5e lowers it through f32 internally; still correct).
        o_ref[...] = x * att.astype(x.dtype)


def sse_forward(x, weight, bias, *, tile_hw=None, tile_n=None,
                vmem_limit_bytes=None):
    """x: (N, C, H, W); weight: (1, C, 1, 1); bias: (1,)."""
    n, c, h, w_sp = x.shape
    hw = h * w_sp
    itemsize = jnp.dtype(x.dtype).itemsize

    vmem_bytes = _detect_vmem_bytes()
    auto_tn, auto_t = _choose_blocks(n, c, hw, itemsize, vmem_bytes)
    if tile_hw is None:
        tile_hw = auto_t
    if tile_n is None:
        tile_n = auto_tn
    tile_hw = min(tile_hw, hw)
    tile_n = min(tile_n, n)

    num_hw_tiles = pl.cdiv(hw, tile_hw)
    num_n_tiles = pl.cdiv(n, tile_n)

    # Guarantee >= 2 grid steps when possible so both v7x TensorCores stream
    # ("parallel" axes are sharded across cores).
    if num_hw_tiles * num_n_tiles == 1:
        if hw >= 256:
            tile_hw = _round_up(pl.cdiv(hw, 2), 128)
            num_hw_tiles = pl.cdiv(hw, tile_hw)
        elif n >= 2:
            tile_n = pl.cdiv(n, 2)
            num_n_tiles = pl.cdiv(n, tile_n)

    if vmem_limit_bytes is None:
        vmem_limit_bytes = min(vmem_bytes * 3 // 4, 96 * 1024 * 1024)

    x_flat = x.reshape(n, c, hw)                          # glue reshape (plain JAX)
    w_col = weight.reshape(1, c, 1).astype(jnp.float32)   # (1, C, 1) VMEM
    b_vec = bias.reshape(1).astype(jnp.float32)           # (1,) -> SMEM

    cost = pl.CostEstimate(
        flops=3 * n * c * hw,                  # reduce mul+add, scale mul
        transcendentals=n * hw,                # sigmoid
        bytes_accessed=2 * n * c * hw * itemsize + c * 4 + 4,
    )

    out_flat = pl.pallas_call(
        _sse_kernel,
        out_shape=jax.ShapeDtypeStruct((n, c, hw), x.dtype),
        grid_spec=pltpu.PrefetchScalarGridSpec(
            num_scalar_prefetch=0,
            # HW tiles leading so the parallel iteration space stays large
            # even for tiny N (better megacore / 2-TC balance).
            grid=(num_hw_tiles, num_n_tiles),
            in_specs=[
                pl.BlockSpec((tile_n, c, tile_hw), lambda j, i: (i, 0, j)),
                pl.BlockSpec((1, c, 1), lambda j, i: (0, 0, 0)),
                pl.BlockSpec(memory_space=pltpu.MemorySpace.SMEM),
            ],
            out_specs=pl.BlockSpec((tile_n, c, tile_hw), lambda j, i: (i, 0, j)),
        ),
        compiler_params=pltpu.CompilerParams(
            dimension_semantics=("parallel", "parallel"),
            vmem_limit_bytes=vmem_limit_bytes,
        ),
        cost_estimate=cost,
    )(x_flat, w_col, b_vec)

    return out_flat.reshape(n, c, h, w_sp)


def _reference(x, weight, bias):
    c = x.shape[1]
    xf = x.astype(jnp.float32)
    att = jax.nn.sigmoid(
        jnp.einsum("nchw,c->nhw", xf, weight.reshape(c).astype(jnp.float32))
        + bias.astype(jnp.float32)[0])[:, None]
    return (xf * att).astype(x.dtype)


if __name__ == "__main__":
    key = jax.random.PRNGKey(0)
    kx, kw, kb = jax.random.split(key, 3)

    N, C, H, W = 2, 4, 16, 16
    x = jax.random.normal(kx, (N, C, H, W), dtype=jnp.float32)
    # Deterministic synthetic parameters (no checkpoint load).
    weight = jax.random.normal(kw, (1, C, 1, 1), dtype=jnp.float32) * 0.1
    bias = jax.random.normal(kb, (1,), dtype=jnp.float32) * 0.1

    ref = _reference(x, weight, bias)

    # 1) Auto tiling (full-extent HW block for this small shape; grid >= 2
    #    steps via the batch axis).
    out = jax.block_until_ready(sse_forward(x, weight, bias))
    assert out.shape == (N, C, H, W)
    assert jnp.allclose(out, ref, atol=1e-5, rtol=1e-5)

    # 2) Forced HW tiling (128-lane tiles -> grid (2, 2)) to exercise the
    #    multi-tile streaming path that production shapes take.
    out_tiled = jax.block_until_ready(sse_forward(x, weight, bias, tile_hw=128))
    assert jnp.allclose(out_tiled, ref, atol=1e-5, rtol=1e-5)

    # 3) Tiny feature map (H*W < 128): batch-blocked path (block (TN, C, HW)).
    xs = jax.random.normal(kx, (N, C, 8, 8), dtype=jnp.float32)
    ref_s = _reference(xs, weight, bias)
    out_s = jax.block_until_ready(sse_forward(xs, weight, bias))
    assert jnp.allclose(out_s, ref_s, atol=1e-5, rtol=1e-5)

    # 4) bf16 input: f32 reduce + sigmoid, native bf16 scale/store.
    xb = x.astype(jnp.bfloat16)
    ref_b = _reference(xb, weight, bias)
    out_b = jax.block_until_ready(sse_forward(xb, weight, bias))
    assert jnp.allclose(out_b.astype(jnp.float32), ref_b.astype(jnp.float32),
                        atol=5e-2, rtol=5e-2)

    print("KERNEL_OK")
</pallas_src>

<mosaic_0001>
module attributes {stable_mosaic.version = 11 : i64} {
  func.func @_sse_kernel(%arg0: i32, %arg1: i32, %arg2: memref<1x4x256xf32, #tpu.memory_space<vmem>>, %arg3: memref<1x4x1xf32, #tpu.memory_space<vmem>>, %arg4: memref<1xf32, #tpu.memory_space<smem>>, %arg5: memref<1x4x256xf32, #tpu.memory_space<vmem>>) attributes {dimension_semantics = [#tpu.dimension_semantics<parallel>, #tpu.dimension_semantics<parallel>], iteration_bounds = array<i64: 1, 2>, scalar_prefetch = 0 : i64, scratch_operands = 0 : i64, tpu.core_type = #tpu.core_type<tc>, window_params = [{transform_indices = @transform_0, window_bounds = array<i64: 1, 4, 256>}, {pipeline_mode = #tpu.pipeline_mode<synchronous>, transform_indices = @transform_1, window_bounds = array<i64: 1, 4, 1>}, {transform_indices = @transform_2, window_bounds = array<i64: 1>}, {transform_indices = @transform_3, window_bounds = array<i64: 1, 4, 256>}]} {
    %c0 = arith.constant 0 : index
    %c0_0 = arith.constant 0 : index
    %c0_1 = arith.constant 0 : index
    %0 = vector.load %arg2[%c0, %c0_0, %c0_1] : memref<1x4x256xf32, #tpu.memory_space<vmem>>, vector<1x4x256xf32>
    %c0_2 = arith.constant 0 : index
    %c0_3 = arith.constant 0 : index
    %c0_4 = arith.constant 0 : index
    %1 = vector.load %arg3[%c0_2, %c0_3, %c0_4] : memref<1x4x1xf32, #tpu.memory_space<vmem>>, vector<1x4x1xf32>
    %2 = vector.broadcast %1 : vector<1x4x1xf32> to vector<1x4x256xf32>
    %3 = arith.mulf %0, %2 : vector<1x4x256xf32>
    %cst = arith.constant dense<0.000000e+00> : vector<1x256xf32>
    %4 = vector.multi_reduction <add>, %3, %cst [1] : vector<1x4x256xf32> to vector<1x256xf32>
    %5 = vector.shape_cast %4 : vector<1x256xf32> to vector<1x1x256xf32>
    %c0_5 = arith.constant 0 : index
    %6 = memref.load %arg4[%c0_5] : memref<1xf32, #tpu.memory_space<smem>>
    %7 = vector.broadcast %6 : f32 to vector<1x1x256xf32>
    %8 = arith.addf %5, %7 : vector<1x1x256xf32>
    %9 = arith.negf %8 : vector<1x1x256xf32>
    %10 = math.exp %9 : vector<1x1x256xf32>
    %cst_6 = arith.constant 1.000000e+00 : f32
    %11 = vector.broadcast %cst_6 : f32 to vector<1x1x256xf32>
    %12 = arith.addf %11, %10 : vector<1x1x256xf32>
    %13 = arith.divf %11, %12 : vector<1x1x256xf32>
    %14 = vector.broadcast %13 : vector<1x1x256xf32> to vector<1x4x256xf32>
    %15 = arith.mulf %0, %14 : vector<1x4x256xf32>
    %c0_7 = arith.constant 0 : index
    %c0_8 = arith.constant 0 : index
    %c0_9 = arith.constant 0 : index
    %16 = vector.load %arg5[%c0_7, %c0_8, %c0_9] : memref<1x4x256xf32, #tpu.memory_space<vmem>>, vector<1x4x256xf32>
    tpu.vector_store %arg5[%c0_7, %c0_8, %c0_9], %15 {strides = array<i32>} : memref<1x4x256xf32, #tpu.memory_space<vmem>>, vector<1x4x256xf32>,
    return
  }
  func.func @transform_0(%arg0: i32, %arg1: i32) -> (i32, i32, i32) {
    %c0_i32 = arith.constant 0 : i32
    %c0_i32_0 = arith.constant 0 : i32
    return %arg1, %c0_i32, %arg0 : i32, i32, i32
  }
  func.func @transform_1(%arg0: i32, %arg1: i32) -> (i32, i32, i32) {
    %c0_i32 = arith.constant 0 : i32
    %c0_i32_0 = arith.constant 0 : i32
    %c0_i32_1 = arith.constant 0 : i32
    %c0_i32_2 = arith.constant 0 : i32
    return %c0_i32, %c0_i32_0, %c0_i32_1 : i32, i32, i32
  }
  func.func @transform_2(%arg0: i32, %arg1: i32) -> i32 {
    %c0_i32 = arith.constant 0 : i32
    %c0_i32_0 = arith.constant 0 : i32
    return %c0_i32 : i32
  }
  func.func @transform_3(%arg0: i32, %arg1: i32) -> (i32, i32, i32) {
    %c0_i32 = arith.constant 0 : i32
    %c0_i32_0 = arith.constant 0 : i32
    return %arg1, %c0_i32, %arg0 : i32, i32, i32
  }
}

</mosaic_0001>

<bundles_post_ra>
// kernel: tpu_custom_call.1
= control target key start
LH: loop header
LB: loop body
LE: loop exit
PB: predicated region body
PF: predicated region fallthrough
CT: control target
= control target key end

     0   :  { %s734_s0 = inlined_call_operand.hbm [shape: f32[2,4,256], index: 0, kind: input, shape index: {}]   ;;  %s735_s1 = inlined_call_operand.vmem [shape: f32[1,4,1], index: 1, kind: input, shape index: {}]   ;;  %s736_s2 = inlined_call_operand.<no memory space> [shape: f32[1], index: 2, kind: input, shape index: {}]   ;;  %s737_s3 = inlined_call_operand.hbm [shape: f32[2,4,256], index: 3, kind: output, shape index: {}]  }
   0x1   :  { %8 = sst [smem:[#allocation2]] %s736_s2 }
   0x2   :  { %9 = vsyncpa [#allocation4], 0 }
   0x3   :  { %11 = vsyncpa [#allocation4 + $0x1], 0 }
   0x4   :  { %12 = vsyncpa [#allocation5], 0 }
   0x5   :  { %14 = vsyncpa [#allocation5 + $0x1], 0  ;;  %s593_s14 = smov 0   ;;  %s595_s15 = smov 0  }
   0x6   :  { %s597_s16 = smov 0   ;;  %s599_s17 = smov 0  }
   0x7   :  { %s601_s18 = smov 0   ;;  %s603_s19 = smov 0  }
   0x8 LB: > { %s364_s2 = sadd.s32 4294967295, %s564_s19   ;;  %s365_s20 = sadd.s32 4294967294, %s564_s19   ;;  %s564_s19 = sphi %s603_s19, %s20_s19   ;;  %s560_s18 = sphi %s601_s18, %s749_s18   ;;  %s556_s17 = sphi %s599_s17, %s748_s17   ;;  %s552_s16 = sphi %s597_s16, %s747_s16   ;;  %s548_s15 = sphi %s595_s15, %s746_s15   ;;  %s544_s14 = sphi %s593_s14, %s745_s14  }
   0x9   : > { %s29_s21 = sadd.s32 1, %s560_s18  ;;  %s41_s22 = sadd.s32 1, %s552_s16 }
   0xa   : > { %p30_p0 = scmp.ge.s32.totalorder %s29_s21, 2  ;;  %p48_p1 = scmp.ne.s32.totalorder %s552_s16, %s548_s15 }
   0xb   : > { %p49_p2 = scmp.eq.s32.totalorder %s564_s19, 0  ;;  %p54_p3 = scmp.ne.s32.totalorder %s548_s15, %s544_s14 }
   0xc   : > { %s751_s21 = smov (%p30_p0, %s29_s21), 0  ;;  %p55_p5 = scmp.eq.s32.totalorder %s364_s2, 0 }
   0xd   : > { %p634_p4 = por %p49_p2, %p48_p1  ;;  %s36_s24 = ssub.s32 %s560_s18, %s751_s21 }
   0xe   : > { %p122_p6 = scmp.eq.s32.totalorder %s364_s2, 1  ;;  %p39_p7 = scmp.eq.s32.totalorder %s36_s24, 0 }
   0xf   : > { %p640_p8 = por %p55_p5, %p54_p3  ;;  %p128_p10 = scmp.eq.s32.totalorder %s365_s20, 1 }
  0x10   : > { %p644_p9 = por %p122_p6, %p48_p1  ;;  %p395_p13 = scmp.lt.s32.totalorder %s564_s19, 2 }
  0x11   : > { %s649_s27 = scalar_select %p39_p7, %s552_s16, %s41_s22  }
  0x12   : > { %p651_p11 = por %p128_p10, %p54_p3  ;;  %s154_s29 = sand.u32 1, %s552_s16  }
  0x13   : > { %s368_s30 = sshll.u32 %s154_s29, 3  ;;  %s381_s4 = sshll.u32 %s560_s18, 7 }
  0x14   : > { %s741_s28 = scalar_select %p651_p11, 1, 0 }
  0x15   : > { %s166_s7 = scalar_lea.hbm %s734_s0, %s381_s4  ;;  %s158_s8 = scalar_lea.vmem [#allocation3], %s368_s30 }
  0x16   : > { %s168_s9 = sshll.u32 %s158_s8, 4  ;;  %p664_p0 = pnand %p395_p13, %p634_p4  ;;  %s169_s9 = int_to_ptr.vmem [resolvable:$true] %s168_s9 }
  0x17   : > { %p371_p1 = scmp.ge.s32.totalorder %s564_s19, 1  ;;  %p173_p2 = scmp.lt.s32.totalorder %s564_s19, 3 }
  0x18   : > { %s155_s11 = scalar_lea.sflag [#allocation4], %s154_s29  ;;  %p458_p3 = pneg %p664_p0 }
  0x19   : > { %s469_s12 = scalar_lea.vmem %s169_s9, 128  ;;  %s566_s13 = smov [#allocation3]  }
  0x1a   : > { %p470_p5 = scmp.ne.s32.totalorder %s169_s9, %s469_s12  ;;  %s474_s2 = sshll.u32 %s566_s13, 4  ;;  %s475_s2 = int_to_ptr.vmem [resolvable:$false] %s474_s2 }
  0x1b   : > { %s476_s20 = scalar_lea.vmem %s475_s2, 256  ;;  %p477_p10 = scmp.lt.s32.totalorder %s169_s9, %s475_s2 }
  0x1c   : > { %p472_p6 = pnand %p470_p5, %p458_p3  ;;  %p478_p12 = scmp.lt.s32.totalorder %s476_s20, %s469_s12 }
  0x1e   : > { %p473_p7 = pneg %p472_p6  ;;  %p479_p4 = por %p478_p12, %p477_p10 }
  0x20   : > { %p480_p13 = pnand %p479_p4, %p473_p7 }
  0x22   : > { %483 = shalt.err (!%p480_p13)
}
  0x23   : > { %390 = dma.hbm_to_vmem [thread:$0]  (!%p664_p0), %s166_s7, 128, %s169_s9, %s155_s11  }
  0x24   : > { %p174_p11 = pnand %p371_p1, %p173_p2 }
  0x25   : > { %s679_s22 = sand.u32 (!%p174_p11), 1, %s548_s15  }
  0x26   : > { %177 = sbr.rel (%p174_p11) target bundleno = 240 (0xf0), region = 32  ;;  %s372_s23 = sshll.u32 (!%p174_p11), %s679_s22, 3 }
  0x27   : > { %s180_s24 = scalar_lea.sflag (!%p174_p11), [#allocation4], %s679_s22  ;;  %s183_s29 = scalar_lea.vmem (!%p174_p11), [#allocation3], %s372_s23 }
  0x2b   : > { %535 = dma.done.wait (%p640_p8), %s180_s24, 128  }
  0x2c   : > { %537 = vsyncadd (%p640_p8), %s180_s24, 4294967168  ;;  %v567_v0 = vmov 0   ;;  %v209_v1 = vld [vmem:[%s735_s1] sm:$0xf]  ;;  %v568_v2 = vmov 839922192   ;;  %v217_v4 = vlaneseq }
  0x2d   : > { %447 = vset.pattern.permute.xlu0 %v567_v0  ;;  %v215_v3 = vunpack.c.l.s4 %v568_v2  ;;  %v208_v9 = vld [vmem:[%s183_s29] sm:$0xff]  ;;  %vm226_vm0 = vcmask 1043456   ;;  %s241_s25 = sld [smem:[#allocation2]]  ;;  %s382_s5 = sshll.u32 %s556_s17, 7 }
  0x2e   : > { %212 = vperm.xlu0 %447, %v209_v1   ;;  %v218_v6 = vshrl.u32 %v217_v4, 7  ;;  %s205_s6 = scalar_lea.vmem [#allocation6], %s372_s23  ;;  %s278_s10 = scalar_lea.hbm %s737_s3, %s382_s5 }
  0x2f   : > { %v216_v5 = vunpack.c.0.s8 %v215_v3  ;;  %s280_s7 = sshll.u32 %s205_s6, 4  ;;  %s264_s11 = scalar_lea.sflag [#allocation5], %s679_s22  ;;  %s281_s7 = int_to_ptr.vmem [resolvable:$true] %s280_s7 }
  0x30   : > { %s484_s12 = scalar_lea.vmem %s281_s7, 128  ;;  %s569_s13 = smov [#allocation6]  }
  0x31   : > { %v219_v7 = vsub.s32 %v216_v5, %v218_v6  ;;  %p485_p8 = scmp.ne.s32.totalorder %s281_s7, %s484_s12  ;;  %s488_s2 = sshll.u32 %s569_s13, 4  ;;  %s489_s2 = int_to_ptr.vmem [resolvable:$false] %s488_s2 }
  0x32   : > { %s490_s17 = scalar_lea.vmem %s489_s2, 256  ;;  %p491_p0 = scmp.lt.s32.totalorder %s281_s7, %s489_s2 }
  0x33   : > { %v242_v24 = vstv %s241_s25  ;;  %p486_p11 = pnand %p485_p8, %p644_p9  ;;  %p492_p1 = scmp.lt.s32.totalorder %s490_s17, %s484_s12 }
  0x35   : > { %p487_p12 = pneg %p486_p11  ;;  %p493_p2 = por %p492_p1, %p491_p0 }
  0x37   : > { %p494_p3 = pnand %p493_p2, %p487_p12 }
  0xa9   : > { %v213_v8 = vpop.permute.xlu0 %212 }
  0xaa   : > { %v220_v10 = vrot.slane %v213_v8, %v219_v7 }
  0xac   : > { %v222_v11 = vmul.f32 %v220_v10, %v208_v9 }
  0xae   : > { %v224_v12 = vcombine.high %v222_v11, %v222_v11  ;;  %v227_v13 = vsel %vm226_vm0, %v222_v11, 0.0 }
  0xaf   : > { %v228_v14 = vrot.slane %v227_v13, 4 }
  0xb0   : > { %v234_v15 = vsel %vm226_vm0, %v224_v12, 0.0 }
  0xb1   : > { %v229_v16 = vadd.f32 %v228_v14, %v227_v13  ;;  %v235_v17 = vrot.slane %v234_v15, 4 }
  0xb3   : > { %v230_v18 = vrot.slane %v229_v16, 2  ;;  %v236_v19 = vadd.f32 %v235_v17, %v234_v15 }
  0xb5   : > { %v231_v20 = vadd.f32 %v230_v18, %v229_v16  ;;  %v237_v21 = vrot.slane %v236_v19, 2 }
  0xb7   : > { %v232_v22 = vrot.slane %v231_v20, 1  ;;  %v238_v23 = vadd.f32 %v237_v21, %v236_v19 }
  0xb9   : > { %v233_v25 = vadd.f32 %v232_v22, %v231_v20  ;;  %v239_v26 = vrot.slane %v238_v23, 1 }
  0xbb   : > { %v240_v27 = vadd.f32 %v239_v26, %v238_v23  ;;  %v243_v28 = vadd.f32 %v242_v24, %v233_v25 }
  0xbd   : > { %v244_v29 = vadd.f32 %v242_v24, %v240_v27  ;;  %v374_v30 = vmul.f32 -1.442695, %v243_v28 }
  0xbf   : > { %448 = vpow2.f32 %v374_v30  ;;  %v375_v31 = vmul.f32 -1.442695, %v244_v29 }
  0xc1   : > { %450 = vpow2.f32 %v375_v31 }
  0xcc   : > { %v449_v32 = vpop.eup %448 }
  0xcd   : > { %v251_v33 = vadd.f32 1.0, %v449_v32 }
  0xce   : > { %v451_v34 = vpop.eup %450 }
  0xcf   : > { %v252_v35 = vadd.f32 1.0, %v451_v34  ;;  %452 = vrcp.f32 %v251_v33 }
  0xd1   : > { %454 = vrcp.f32 %v252_v35 }
  0xdc   : > { %v453_v36 = vpop.eup %452 }
  0xde   : > { %v455_v37 = vpop.eup %454 }
  0xdf   : > { %v259_v38 = vcombine.low %v453_v36, %v455_v37 }
  0xe1   : > { %v261_v39 = vmul.f32 %v259_v38, %v208_v9 }
  0xe3   : > { %262 = vst [vmem:[%s205_s6] sm:$0xff] %v261_v39 }
  0xe4   : > { %497 = shalt.err (!%p494_p3)
}
  0xe5   : > { %s498_s20 = scalar_lea.hbm %s278_s10, 128  ;;  %s502_s24 = scalar_lea.hbm %s737_s3, 256 }
  0xe6   : > { %p499_p5 = scmp.ne.s32.totalorder %s278_s10, %s498_s20  ;;  %p503_p10 = scmp.lt.s32.totalorder %s278_s10, %s737_s3 }
  0xe7   : > { %p504_p4 = scmp.lt.s32.totalorder %s502_s24, %s498_s20 }
  0xe8   : > { %p500_p6 = pnand %p499_p5, %p644_p9 }
  0xe9   : > { %p505_p13 = por %p504_p4, %p503_p10 }
  0xea   : > { %p501_p7 = pneg %p500_p6 }
  0xec   : > { %p506_p8 = pnand %p505_p13, %p501_p7 }
  0xee   : > { %509 = shalt.err (!%p506_p8)
}
  0xef   : > { %385 = dma.vmem_to_hbm [thread:$0]  (%p644_p9), %s281_s7, 128, %s278_s10, %s264_s11  }
  0xf0 PF: > { %s292_s4 = sand.u32 1, %s544_s14   ;;  %p743_p11 = scmp.ne.s32.totalorder %s741_s28, 0 }
  0xf1   : > { %p744_p12 = scmp.ge.s32.totalorder %s564_s19, 2  ;;  %s293_s25 = scalar_lea.sflag [#allocation5], %s292_s4 }
  0xf3   : > { %p392_p0 = pnand %p744_p12, %p743_p11 }
  0xf5   : > { %p393_p1 = pneg %p392_p0 }
  0xf7   : > { %539 = dma.done.wait (%p393_p1), %s293_s25, 128  }
  0xf8   : > { %541 = vsyncadd (%p393_p1), %s293_s25, 4294967168  ;;  %s20_s19 = sadd.s32 1, %s564_s19   ;;  %s745_s14 = smov %s548_s15 }
  0xf9   : > { %p17_p2 = scmp.ge.s32.totalorder %s20_s19, 4   ;;  %s746_s15 = smov %s552_s16 }
  0xfa   : > { %s747_s16 = smov %s649_s27  ;;  %s748_s17 = smov %s560_s18 }
  0xfb   : > { %s749_s18 = smov %s751_s21  ;;  %19 = sbr.rel (!%p17_p2) target bundleno = 8 (0x8), region = 77 }
 0x100   :  { %298 = vsyncpa [#allocation4], 1 }
 0x101   :  { %300 = vsyncpa [#allocation4 + $0x1], 1 }
 0x102   :  { %301 = vsyncpa [#allocation5], 1 }
 0x103   :  { %303 = vsyncpa [#allocation5 + $0x1], 1 }

</bundles_post_ra>
